<compile_context>
chip_gen: v7x
topology: tpu7x:2x2x1
jax: 0.10.0
libtpu: 0.0.40
codegen_flags: <defaults>
</compile_context>

<pallas_src>
import jax
import jax.numpy as jnp
from jax.experimental import pallas as pl
from jax.experimental.pallas import tpu as pltpu

_VMEM_TILE_BUDGET = 20 * 1024 * 1024   # per-step footprint target (v7x-safe)
_VMEM_LIMIT = 48 * 1024 * 1024         # scoped VMEM limit (safe on v5e/v6e/v7x)


def _attention_kernel(x_ref, mask_ref, w_ref, b_ref, out_ref, attn_ref):
    """One grid step == one batch block.

    x_ref:    (bb, T, H) input dtype (f32 or bf16) -- upcast in-kernel
    mask_ref: (bb, T)    int32 (nonzero == valid)
    w_ref:    (1, H)     f32 attention projection weight
    b_ref:    (1, 1)     f32 attention projection bias
    out_ref:  (bb, H)    attended output
    attn_ref: (bb, T)    attention weights
    """
    x = x_ref[...].astype(jnp.float32)          # upcast under the DMA (free VPU work)
    w = w_ref[...].astype(jnp.float32)          # (1, H)
    valid = mask_ref[...] != 0                  # (bb, T)

    # Linear(H -> 1): elementwise multiply + lane reduction (VPU + XLU).
    scores = jnp.sum(x * w[None, :, :], axis=-1) + b_ref[...]    # (bb, T)

    # masked_fill(~mask, -inf) -- Python scalar literal, not a captured constant.
    scores = jnp.where(valid, scores, float("-inf"))

    # Numerically stable softmax over the sequence dimension; the divide is
    # moved onto the (otherwise idle) EUP via an approximate reciprocal.
    m = jnp.max(scores, axis=-1, keepdims=True)                  # (bb, 1)
    e = jnp.exp(scores - m)                                      # (bb, T); masked -> 0
    denom = jnp.sum(e, axis=-1, keepdims=True)                   # (bb, 1)
    attn = e * pl.reciprocal(denom, approx=True)                 # (bb, T)

    attn_ref[...] = attn.astype(attn_ref.dtype)
    # attended = sum_t rnn_out[:, t, :] * attn[:, t]
    out_ref[...] = jnp.sum(x * attn[..., None], axis=1).astype(out_ref.dtype)


def _pick_batch_block(b_padded, seq, hidden, in_itemsize, out_itemsize):
    """Largest multiple-of-8 divisor of b_padded whose double-buffered footprint
    fits the VMEM budget; prefer one leaving >= 2 grid steps (v7x megacore)."""
    def footprint(bb):
        x_b = bb * seq * hidden * in_itemsize
        m_b = bb * seq * 4
        o_b = bb * hidden * out_itemsize + bb * seq * out_itemsize
        return 2 * (x_b + m_b + o_b)    # inputs & outputs are double-buffered

    cands = [m for m in range(8, b_padded + 1, 8) if b_padded % m == 0]
    feasible = [m for m in cands if footprint(m) <= _VMEM_TILE_BUDGET] or [cands[0]]
    multi_step = [m for m in feasible if b_padded // m >= 2]
    return max(multi_step) if multi_step else max(feasible)


def attention_forward(params, rnn_out, mask=None):
    """rnn_out: (B, T, H) f32 or bf16; mask: (B, T) bool or None.

    Returns (attended_output (B, H), attn_weights (B, T)), matching the
    PyTorch module's forward.
    """
    B, T, H = rnn_out.shape
    dtype = rnn_out.dtype
    if mask is None:
        mask = jnp.ones((B, T), dtype=bool)

    # Pad the batch to a multiple of 8; padded rows are fully valid (no NaNs)
    # and are sliced off before returning.
    B_pad = ((B + 7) // 8) * 8
    x = rnn_out                                   # keep native dtype on the wire
    mask_i32 = mask.astype(jnp.int32)
    if B_pad != B:
        x = jnp.pad(x, ((0, B_pad - B), (0, 0), (0, 0)))
        mask_i32 = jnp.pad(mask_i32, ((0, B_pad - B), (0, 0)), constant_values=1)

    itemsize = dtype.itemsize
    bb = _pick_batch_block(B_pad, T, H, itemsize, itemsize)
    grid = (B_pad // bb,)

    in_specs = [
        pl.BlockSpec((bb, T, H), lambda i: (i, 0, 0)),   # rnn_out block
        pl.BlockSpec((bb, T), lambda i: (i, 0)),         # mask block
        pl.BlockSpec((1, H), lambda i: (0, 0)),          # attn weight (loop-invariant)
        pl.BlockSpec((1, 1), lambda i: (0, 0)),          # attn bias
    ]
    out_specs = (
        pl.BlockSpec((bb, H), lambda i: (i, 0)),         # attended_output
        pl.BlockSpec((bb, T), lambda i: (i, 0)),         # attn_weights
    )
    out_shapes = (jax.ShapeDtypeStruct((B_pad, H), dtype),
                  jax.ShapeDtypeStruct((B_pad, T), dtype))

    cost = pl.CostEstimate(
        flops=int(4 * B_pad * T * H),          # score mul+add, weighted-sum mul+add
        transcendentals=int(B_pad * T),        # exp (+ reciprocal)
        bytes_accessed=int(B_pad * T * H * itemsize    # x
                           + B_pad * T * 4             # mask
                           + B_pad * H * itemsize      # attended out
                           + B_pad * T * itemsize      # attn out
                           + (H + 1) * 4),             # w, b
    )

    attended, attn = pl.pallas_call(
        _attention_kernel,
        out_shape=out_shapes,
        grid=grid,
        in_specs=in_specs,
        out_specs=out_specs,
        compiler_params=pltpu.CompilerParams(
            dimension_semantics=("parallel",),
            vmem_limit_bytes=_VMEM_LIMIT),
        cost_estimate=cost,
    )(x, mask_i32, params["w"].astype(jnp.float32), params["b"].astype(jnp.float32))

    if B_pad != B:
        attended, attn = attended[:B], attn[:B]
    return attended, attn


def init_params(key, hidden_dim):
    """nn.Linear(hidden_dim, 1): weight (1, H), bias (1,) -> stored as (1, 1)."""
    k1, k2 = jax.random.split(key)
    bound = 1.0 / float(jnp.sqrt(hidden_dim))
    w = jax.random.uniform(k1, (1, hidden_dim), jnp.float32, -bound, bound)
    b = jax.random.uniform(k2, (1, 1), jnp.float32, -bound, bound)
    return {"w": w, "b": b}


def reference_attention(params, rnn_out, mask=None):
    """Pure-JAX reference mirroring the PyTorch forward."""
    scores = jnp.einsum("bth,h->bt", rnn_out, params["w"][0]) + params["b"][0, 0]
    if mask is not None:
        scores = jnp.where(mask, scores, -jnp.inf)
    attn = jax.nn.softmax(scores, axis=-1)
    attended = jnp.sum(rnn_out * attn[..., None], axis=1)
    return attended, attn


if __name__ == "__main__":
    # Small shapes consistent with the module: batch=2, seq=8, hidden=32.
    B, T, H = 2, 8, 32

    key = jax.random.PRNGKey(0)
    kx, kp = jax.random.split(key)
    rnn_out = jax.random.normal(kx, (B, T, H), jnp.float32)
    lengths = jnp.array([8, 5], dtype=jnp.int32)
    mask = jnp.arange(T)[None, :] < lengths[:, None]          # (B, T) bool

    params = init_params(kp, H)

    attended, attn = attention_forward(params, rnn_out, mask)
    jax.block_until_ready((attended, attn))

    # Sanity check against the pure-JAX reference.  Tolerances allow for the
    # EUP approximate reciprocal used in the softmax normalization.
    ref_att, ref_attn = reference_attention(params, rnn_out, mask)
    assert attended.shape == (B, H) and attn.shape == (B, T)
    assert jnp.allclose(attended, ref_att, atol=5e-3, rtol=5e-3), \
        float(jnp.abs(attended - ref_att).max())
    assert jnp.allclose(attn, ref_attn, atol=5e-3, rtol=5e-3), \
        float(jnp.abs(attn - ref_attn).max())
    # Masked positions must receive exactly zero attention weight.
    assert bool(jnp.all(jnp.where(mask, True, attn == 0.0)))
    # Attention weights over valid positions sum to ~1.
    assert bool(jnp.allclose(attn.sum(-1), 1.0, atol=5e-3))

    # Also exercise the no-mask path.
    attended2, attn2 = attention_forward(params, rnn_out, None)
    jax.block_until_ready((attended2, attn2))
    ref_att2, ref_attn2 = reference_attention(params, rnn_out, None)
    assert jnp.allclose(attended2, ref_att2, atol=5e-3, rtol=5e-3)
    assert jnp.allclose(attn2, ref_attn2, atol=5e-3, rtol=5e-3)

    print("KERNEL_OK")
</pallas_src>

<mosaic_0001>
module attributes {stable_mosaic.version = 11 : i64} {
  func.func @_attention_kernel(%arg0: i32, %arg1: memref<8x8x32xf32, #tpu.memory_space<vmem>>, %arg2: memref<8x8xi32, #tpu.memory_space<vmem>>, %arg3: memref<1x32xf32, #tpu.memory_space<vmem>>, %arg4: memref<1x1xf32, #tpu.memory_space<vmem>>, %arg5: memref<8x32xf32, #tpu.memory_space<vmem>>, %arg6: memref<8x8xf32, #tpu.memory_space<vmem>>) attributes {dimension_semantics = [#tpu.dimension_semantics<parallel>], iteration_bounds = array<i64: 1>, scalar_prefetch = 0 : i64, scratch_operands = 0 : i64, tpu.core_type = #tpu.core_type<tc>, window_params = [{transform_indices = @transform_0, window_bounds = array<i64: 8, 8, 32>}, {transform_indices = @transform_1, window_bounds = array<i64: 8, 8>}, {pipeline_mode = #tpu.pipeline_mode<synchronous>, transform_indices = @transform_2, window_bounds = array<i64: 1, 32>}, {pipeline_mode = #tpu.pipeline_mode<synchronous>, transform_indices = @transform_3, window_bounds = array<i64: 1, 1>}, {transform_indices = @transform_4, window_bounds = array<i64: 8, 32>}, {transform_indices = @transform_5, window_bounds = array<i64: 8, 8>}]} {
    %c0 = arith.constant 0 : index
    %c0_0 = arith.constant 0 : index
    %c0_1 = arith.constant 0 : index
    %0 = vector.load %arg1[%c0, %c0_0, %c0_1] : memref<8x8x32xf32, #tpu.memory_space<vmem>>, vector<8x8x32xf32>
    %c0_2 = arith.constant 0 : index
    %c0_3 = arith.constant 0 : index
    %1 = vector.load %arg3[%c0_2, %c0_3] : memref<1x32xf32, #tpu.memory_space<vmem>>, vector<1x32xf32>
    %c0_4 = arith.constant 0 : index
    %c0_5 = arith.constant 0 : index
    %2 = vector.load %arg2[%c0_4, %c0_5] : memref<8x8xi32, #tpu.memory_space<vmem>>, vector<8x8xi32>
    %c0_i32 = arith.constant 0 : i32
    %3 = vector.broadcast %c0_i32 : i32 to vector<8x8xi32>
    %4 = arith.cmpi ne, %2, %3 : vector<8x8xi32>
    %5 = vector.shape_cast %1 : vector<1x32xf32> to vector<1x1x32xf32>
    %6 = vector.broadcast %5 : vector<1x1x32xf32> to vector<8x8x32xf32>
    %7 = arith.mulf %0, %6 : vector<8x8x32xf32>
    %cst = arith.constant dense<0.000000e+00> : vector<8x8xf32>
    %8 = vector.multi_reduction <add>, %7, %cst [2] : vector<8x8x32xf32> to vector<8x8xf32>
    %c0_6 = arith.constant 0 : index
    %c0_7 = arith.constant 0 : index
    %9 = vector.load %arg4[%c0_6, %c0_7] : memref<1x1xf32, #tpu.memory_space<vmem>>, vector<1x1xf32>
    %10 = vector.broadcast %9 : vector<1x1xf32> to vector<8x8xf32>
    %11 = arith.addf %8, %10 : vector<8x8xf32>
    %cst_8 = arith.constant 0xFF800000 : f32
    %12 = vector.broadcast %cst_8 : f32 to vector<8x8xf32>
    %13 = arith.select %4, %11, %12 : vector<8x8xi1>, vector<8x8xf32>
    %cst_9 = arith.constant dense<0xFF800000> : vector<8xf32>
    %14 = vector.multi_reduction <maximumf>, %13, %cst_9 [1] : vector<8x8xf32> to vector<8xf32>
    %15 = vector.shape_cast %14 : vector<8xf32> to vector<8x1xf32>
    %16 = vector.broadcast %15 : vector<8x1xf32> to vector<8x8xf32>
    %17 = arith.subf %13, %16 : vector<8x8xf32>
    %18 = math.exp %17 : vector<8x8xf32>
    %cst_10 = arith.constant dense<0.000000e+00> : vector<8xf32>
    %19 = vector.multi_reduction <add>, %18, %cst_10 [1] : vector<8x8xf32> to vector<8xf32>
    %20 = vector.shape_cast %19 : vector<8xf32> to vector<8x1xf32>
    %21 = tpu.reciprocal %20 {approx = true} : vector<8x1xf32> -> vector<8x1xf32>
    %22 = vector.broadcast %21 : vector<8x1xf32> to vector<8x8xf32>
    %23 = arith.mulf %18, %22 : vector<8x8xf32>
    %c0_11 = arith.constant 0 : index
    %c0_12 = arith.constant 0 : index
    %24 = vector.load %arg6[%c0_11, %c0_12] : memref<8x8xf32, #tpu.memory_space<vmem>>, vector<8x8xf32>
    tpu.vector_store %arg6[%c0_11, %c0_12], %23 {strides = array<i32>} : memref<8x8xf32, #tpu.memory_space<vmem>>, vector<8x8xf32>,
    %25 = vector.shape_cast %23 : vector<8x8xf32> to vector<8x8x1xf32>
    %26 = vector.broadcast %25 : vector<8x8x1xf32> to vector<8x8x32xf32>
    %27 = arith.mulf %0, %26 : vector<8x8x32xf32>
    %cst_13 = arith.constant dense<0.000000e+00> : vector<8x32xf32>
    %28 = vector.multi_reduction <add>, %27, %cst_13 [1] : vector<8x8x32xf32> to vector<8x32xf32>
    %c0_14 = arith.constant 0 : index
    %c0_15 = arith.constant 0 : index
    %29 = vector.load %arg5[%c0_14, %c0_15] : memref<8x32xf32, #tpu.memory_space<vmem>>, vector<8x32xf32>
    tpu.vector_store %arg5[%c0_14, %c0_15], %28 {strides = array<i32>} : memref<8x32xf32, #tpu.memory_space<vmem>>, vector<8x32xf32>,
    return
  }
  func.func @transform_0(%arg0: i32) -> (i32, i32, i32) {
    %c0_i32 = arith.constant 0 : i32
    %c0_i32_0 = arith.constant 0 : i32
    %c0_i32_1 = arith.constant 0 : i32
    return %arg0, %c0_i32, %c0_i32_0 : i32, i32, i32
  }
  func.func @transform_1(%arg0: i32) -> (i32, i32) {
    %c0_i32 = arith.constant 0 : i32
    %c0_i32_0 = arith.constant 0 : i32
    return %arg0, %c0_i32 : i32, i32
  }
  func.func @transform_2(%arg0: i32) -> (i32, i32) {
    %c0_i32 = arith.constant 0 : i32
    %c0_i32_0 = arith.constant 0 : i32
    %c0_i32_1 = arith.constant 0 : i32
    return %c0_i32, %c0_i32_0 : i32, i32
  }
  func.func @transform_3(%arg0: i32) -> (i32, i32) {
    %c0_i32 = arith.constant 0 : i32
    %c0_i32_0 = arith.constant 0 : i32
    %c0_i32_1 = arith.constant 0 : i32
    return %c0_i32, %c0_i32_0 : i32, i32
  }
  func.func @transform_4(%arg0: i32) -> (i32, i32) {
    %c0_i32 = arith.constant 0 : i32
    %c0_i32_0 = arith.constant 0 : i32
    return %arg0, %c0_i32 : i32, i32
  }
  func.func @transform_5(%arg0: i32) -> (i32, i32) {
    %c0_i32 = arith.constant 0 : i32
    %c0_i32_0 = arith.constant 0 : i32
    return %arg0, %c0_i32 : i32, i32
  }
}

</mosaic_0001>

<bundles_post_ra>
// kernel: tpu_custom_call.1
= control target key start
LH: loop header
LB: loop body
LE: loop exit
PB: predicated region body
PF: predicated region fallthrough
CT: control target
= control target key end

     0   :  { %s633_s0 = inlined_call_operand.hbm [shape: f32[8,8,32], index: 0, kind: input, shape index: {}]   ;;  %s634_s1 = inlined_call_operand.hbm [shape: s32[8,8], index: 1, kind: input, shape index: {}]   ;;  %s635_s2 = inlined_call_operand.vmem [shape: f32[1,32], index: 2, kind: input, shape index: {}]   ;;  %s636_s3 = inlined_call_operand.<no memory space> [shape: f32[1,1], index: 3, kind: input, shape index: {}]   ;;  %s637_s4 = inlined_call_operand.hbm [shape: f32[8,32], index: 4, kind: output, shape index: {0}]   ;;  %s638_s5 = inlined_call_operand.hbm [shape: f32[8,8], index: 5, kind: output, shape index: {1}]  }
   0x1   :  { %v11_v0 = vstv %s636_s3 }
   0x2   :  { %12 = vst [vmem:[#allocation2] sm:$0x1] %v11_v0 }
   0x3   :  { %13 = vsyncpa [#allocation4], 0 }
   0x4   :  { %14 = vsyncpa [#allocation7], 0 }
   0x5   :  { %15 = vsyncpa [#allocation5], 0 }
   0x6   :  { %16 = vsyncpa [#allocation10], 0  ;;  %s465_s20 = smov [#allocation3]   ;;  %s369_s24 = scalar_lea.hbm %s633_s0, 1024 }
   0x7   :  { %s22_s21 = sshll.u32 %s465_s20, 4  ;;  %p370_p0 = scmp.ne.s32.totalorder %s633_s0, %s369_s24  ;;  %s23_s21 = int_to_ptr.vmem [resolvable:$true] %s22_s21 }
   0x8   :  { %p373_p1 = scmp.lt.u32.totalorder %s369_s24, %s633_s0 }
   0xa   :  { %p375_p2 = pnand %p373_p1, %p370_p0 }
   0xc   :  { %378 = shalt.err (!%p375_p2)
}
   0xd   :  { %s379_s3 = scalar_lea.vmem %s23_s21, 1024  ;;  %p384_p4 = scmp.lt.s32.totalorder %s23_s21, %s23_s21 }
   0xe   :  { %p380_p3 = scmp.ne.s32.totalorder %s23_s21, %s379_s3  ;;  %p385_p5 = scmp.lt.s32.totalorder %s379_s3, %s379_s3 }
  0x10   :  { %p386_p6 = por %p385_p5, %p384_p4 }
  0x12   :  { %p387_p7 = pnand %p386_p6, %p380_p3 }
  0x14   :  { %390 = shalt.err (!%p387_p7)
}
  0x15   :  { %s466_s29 = smov 128   ;;  %s467_s30 = smov 8  }
  0x16   :  { %28 = dma.hbm_to_vmem [thread:$0]  %s633_s0, 1024, %s23_s21, [#allocation4], %s466_s29, %s466_s29, %s467_s30  }
  0x17   :  { %s468_s8 = smov [#allocation6]   ;;  %s391_s12 = scalar_lea.hbm %s634_s1, 128 }
  0x18   :  { %s35_s9 = sshll.u32 %s468_s8, 4  ;;  %p392_p8 = scmp.ne.s32.totalorder %s634_s1, %s391_s12  ;;  %s36_s9 = int_to_ptr.vmem [resolvable:$true] %s35_s9 }
  0x19   :  { %p395_p9 = scmp.lt.u32.totalorder %s391_s12, %s634_s1 }
  0x1b   :  { %p397_p10 = pnand %p395_p9, %p392_p8 }
  0x1d   :  { %400 = shalt.err (!%p397_p10)
}
  0x1e   :  { %s401_s17 = scalar_lea.vmem %s36_s9, 128  ;;  %p406_p12 = scmp.lt.s32.totalorder %s36_s9, %s36_s9 }
  0x1f   :  { %p402_p11 = scmp.ne.s32.totalorder %s36_s9, %s401_s17  ;;  %p407_p13 = scmp.lt.s32.totalorder %s401_s17, %s401_s17 }
  0x21   :  { %p408_p0 = por %p407_p13, %p406_p12 }
  0x23   :  { %p409_p1 = pnand %p408_p0, %p402_p11 }
  0x25   :  { %412 = shalt.err (!%p409_p1)
}
  0x26   :  { %38 = dma.hbm_to_vmem [thread:$0]  %s634_s1, 128, %s36_s9, [#allocation7]  }
  0x27   :  { %457 = dma.done.wait [#allocation4], 1024  }
  0x28   :  { %458 = vsyncadd [#allocation4], 4294966272 }
  0x29   :  { %459 = dma.done.wait [#allocation7], 128  }
  0x2a   :  { %460 = vsyncadd [#allocation7], 4294967168  ;;  %v469_v1 = vmov 0   ;;  %v529_v2 = vld [vmem:[#allocation3] sm:$0xff]  ;;  %v355_v3 = vld [vmem:[%s635_s2] ss:$0 sm:$0xff]  ;;  %v125_v33 = vlaneseq }
  0x2b   :  { %364 = vset.pattern.permute.xlu0 %v469_v1  ;;  %vm74_vm0 = vcmask 261120   ;;  %v534_v4 = vld [vmem:[#allocation3 + $0x8] sm:$0xff]  ;;  %v66_v5 = vmul.f32 %v355_v3, %v529_v2  ;;  %v538_v7 = vld [vmem:[#allocation3 + $0x10] sm:$0xff]  ;;  %v540_v8 = vld [vmem:[#allocation3 + $0x18] sm:$0xff]  ;;  %vm159_vm1 = vcmask 1041409   ;;  %vm161_vm2 = vcmask 1042434  }
  0x2c   :  { %v67_v6 = vmul.f32 %v355_v3, %v534_v4  ;;  %v68_v9 = vmul.f32 %v355_v3, %v538_v7  ;;  %v543_v10 = vld [vmem:[#allocation3 + $0x20] sm:$0xff]  ;;  %v69_v11 = vmul.f32 %v355_v3, %v540_v8  ;;  %v547_v13 = vld [vmem:[#allocation3 + $0x28] sm:$0xff]  ;;  %v553_v18 = vld [vmem:[#allocation3 + $0x30] sm:$0xff]  ;;  %v126_v34 = vand.u32 127, %v125_v33  ;;  %s470_s1 = smov [#allocation9]  }
  0x2d   :  { %v75_v12 = vsel %vm74_vm0, %v66_v5, 0.0  ;;  %v70_v16 = vmul.f32 %v355_v3, %v543_v10  ;;  %v71_v19 = vmul.f32 %v355_v3, %v547_v13  ;;  %v556_v20 = vld [vmem:[#allocation3 + $0x38] sm:$0xff]  ;;  %v72_v22 = vmul.f32 %v355_v3, %v553_v18  ;;  %v58_v54 = vld [vmem:[#allocation6] sm:$0xff]  ;;  %s341_s2 = sshll.u32 %s470_s1, 4  ;;  %s342_s2 = int_to_ptr.vmem [resolvable:$true] %s341_s2 }
  0x2e   :  { %76 = vadd.xlane.f32.xlu0 %v75_v12  ;;  %v81_v14 = vsel %vm74_vm0, %v68_v9, 0.0  ;;  %v78_v15 = vsel %vm74_vm0, %v67_v6, 0.0  ;;  %v84_v17 = vsel %vm74_vm0, %v69_v11, 0.0  ;;  %v73_v24 = vmul.f32 %v355_v3, %v556_v20  ;;  %v356_v27 = vld [vmem:[#allocation2] ss:$0 sm:$0xff]  ;;  %s413_s21 = scalar_lea.vmem %s342_s2, 128  ;;  %p418_p3 = scmp.lt.s32.totalorder %s342_s2, %s342_s2 }
  0x2f   :  { %82 = vadd.xlane.f32.xlu1 %v81_v14  ;;  %v87_v21 = vsel %vm74_vm0, %v70_v16, 0.0  ;;  %v90_v23 = vsel %vm74_vm0, %v71_v19, 0.0  ;;  %v93_v25 = vsel %vm74_vm0, %v72_v22, 0.0  ;;  %v564_v35 = vshrl.u32 %v125_v33, 7  ;;  %p414_p2 = scmp.ne.s32.totalorder %s342_s2, %s413_s21  ;;  %p419_p4 = scmp.lt.s32.totalorder %s413_s21, %s413_s21 }
  0x30   :  { %v96_v26 = vsel %vm74_vm0, %v73_v24, 0.0  ;;  %vm163_vm3 = vcmask 1043459   ;;  %vm165_vm4 = vcmask 1044484   ;;  %vm167_vm5 = vcmask 1045509  }
  0x31   :  { %v129_v38 = vsub.s32 %v126_v34, %v564_v35  ;;  %vm169_vm6 = vcmask 1046534   ;;  %vm171_vm7 = vcmask 1047559   ;;  %vm59_vm8 = vcmp.ne.s32.totalorder %v58_v54, 0  ;;  %p420_p5 = por %p419_p4, %p418_p3 }
  0x32   :  { %79 = vadd.xlane.f32.xlu0 %v78_v15  ;;  %vm175_vm9 = vcmask 64512   ;;  %v232_v15 = vsub.s32 6, %v564_v35  ;;  %v190_v16 = vsub.s32 0, %v564_v35  ;;  %v239_v33 = vsub.s32 7, %v564_v35 }
  0x33   :  { %85 = vadd.xlane.f32.xlu1 %v84_v17  ;;  %p421_p6 = pnand %p420_p5, %p414_p2 }
  0x36   :  { %88 = vadd.xlane.f32.xlu0 %v87_v21 }
  0x37   :  { %91 = vadd.xlane.f32.xlu1 %v90_v23  ;;  %v197_v23 = vsub.s32 1, %v564_v35 }
  0x3a   :  { %94 = vadd.xlane.f32.xlu0 %v93_v25  ;;  %v204_v25 = vsub.s32 2, %v564_v35 }
  0x3b   :  { %97 = vadd.xlane.f32.xlu1 %v96_v26 }
  0x50   :  { %106 = vperm.xlu0 %364, %v356_v27   ;;  %v211_v27 = vsub.s32 3, %v564_v35 }
  0xbb   :  { %v77_v28 = vpop.xlane.xlu0 %76 }
  0xbc   :  { %v83_v30 = vpop.xlane.xlu1 %82 }
  0xbf   :  { %v80_v29 = vpop.xlane.xlu0 %79 }
  0xc0   :  { %v86_v32 = vpop.xlane.xlu1 %85 }
  0xc3   :  { %v89_v31 = vpop.xlane.xlu0 %88 }
  0xc4   :  { %v92_v37 = vpop.xlane.xlu1 %91 }
  0xc7   :  { %v95_v36 = vpop.xlane.xlu0 %94 }
  0xc8   :  { %v98_v44 = vpop.xlane.xlu1 %97 }
  0xcf   :  { %v107_v39 = vpop.permute.xlu0 %106 }
  0xd0   :  { %v109_v40 = vadd.f32 %v107_v39, %v77_v28  ;;  %v110_v41 = vadd.f32 %v107_v39, %v80_v29  ;;  %v111_v42 = vadd.f32 %v107_v39, %v83_v30  ;;  %v112_v43 = vadd.f32 %v107_v39, %v86_v32 }
  0xd1   :  { %v113_v45 = vadd.f32 %v107_v39, %v89_v31  ;;  %v114_v46 = vadd.f32 %v107_v39, %v92_v37  ;;  %v115_v50 = vadd.f32 %v107_v39, %v95_v36  ;;  %v116_v51 = vadd.f32 %v107_v39, %v98_v44 }
  0xd2   :  { %v130_v47 = vrot.slane %v109_v40, %v129_v38  ;;  %v134_v48 = vrot.slane %v110_v41, %v129_v38  ;;  %v138_v49 = vrot.slane %v111_v42, %v129_v38  ;;  %v142_v52 = vrot.slane %v112_v43, %v129_v38 }
  0xd3   :  { %v146_v55 = vrot.slane %v113_v45, %v129_v38  ;;  %v150_v57 = vrot.slane %v114_v46, %v129_v38  ;;  %v154_v59 = vrot.slane %v115_v50, %v129_v38  ;;  %v158_v61 = vrot.slane %v116_v51, %v129_v38 }
  0xd4   :  { %v160_v53 = vsel %vm159_vm1, %v134_v48, %v130_v47  ;;  %v218_v29 = vsub.s32 4, %v564_v35  ;;  %v225_v31 = vsub.s32 5, %v564_v35 }
  0xd5   :  { %v162_v56 = vsel %vm161_vm2, %v138_v49, %v160_v53 }
  0xd6   :  { %v164_v58 = vsel %vm163_vm3, %v142_v52, %v162_v56 }
  0xd7   :  { %v166_v60 = vsel %vm165_vm4, %v146_v55, %v164_v58 }
  0xd8   :  { %v168_v62 = vsel %vm167_vm5, %v150_v57, %v166_v60 }
  0xd9   :  { %v170_v63 = vsel %vm169_vm6, %v154_v59, %v168_v62 }
  0xda   :  { %v172_v0 = vsel %vm171_vm7, %v158_v61, %v170_v63 }
  0xdb   :  { %v174_v1 = vsel %vm59_vm8, %v172_v0, -inf }
  0xdc   :  { %v176_v3 = vsel %vm175_vm9, %v174_v1, -inf }
  0xdd   :  { %177 = vmax.xlane.f32.xlu1 %v176_v3 }
 0x16a   :  { %v178_v5 = vpop.xlane.xlu1 %177 }
 0x16b   :  { %v179_v6 = vsub.f32 %v174_v1, %v178_v5 }
 0x16d   :  { %v180_v9 = vmul.f32 1.442695, %v179_v6 }
 0x16f   :  { %365 = vpow2.f32 %v180_v9 }
 0x179   :  { %v366_v11 = vpop.eup %365 }
 0x17a   :  { %v182_v12 = vsel %vm175_vm9, %v366_v11, 0.0 }
 0x17b   :  { %183 = vadd.xlane.f32.xlu1 %v182_v12 }
 0x208   :  { %v184_v14 = vpop.xlane.xlu1 %183 }
 0x209   :  { %367 = vrcp.f32 %v184_v14 }
 0x213   :  { %v368_v17 = vpop.eup %367 }
 0x214   :  { %v186_v19 = vmul.f32 %v368_v17, %v366_v11 }
 0x216   :  { %187 = vst.msk [vmem:[#allocation9] sm:$0xff] %vm175_vm9, %v186_v19  ;;  %v233_v21 = vrot.slane %v186_v19, %v232_v15  ;;  %v191_v22 = vrot.slane %v186_v19, %v190_v16  ;;  %v198_v24 = vrot.slane %v186_v19, %v197_v23  ;;  %v205_v26 = vrot.slane %v186_v19, %v204_v25 }
 0x217   :  { %v212_v28 = vrot.slane %v186_v19, %v211_v27  ;;  %v219_v30 = vrot.slane %v186_v19, %v218_v29  ;;  %v226_v32 = vrot.slane %v186_v19, %v225_v31  ;;  %v240_v34 = vrot.slane %v186_v19, %v239_v33 }
 0x218   :  { %235 = vbcast.lane.b32.xlu0 %v233_v21, 256  ;;  %193 = vbcast.lane.b32.xlu1 %v191_v22, 256 }
 0x21c   :  { %200 = vbcast.lane.b32.xlu1 %v198_v24, 256 }
 0x220   :  { %207 = vbcast.lane.b32.xlu1 %v205_v26, 256 }
 0x224   :  { %214 = vbcast.lane.b32.xlu1 %v212_v28, 256 }
 0x228   :  { %221 = vbcast.lane.b32.xlu1 %v219_v30, 256 }
 0x22c   :  { %228 = vbcast.lane.b32.xlu1 %v226_v32, 256 }
 0x230   :  { %242 = vbcast.lane.b32.xlu1 %v240_v34, 256 }
 0x231   :  { %424 = shalt.err (!%p421_p6)
}
 0x232   :  { %s425_s24 = scalar_lea.hbm %s638_s5, 128 }
 0x233   :  { %p426_p7 = scmp.ne.s32.totalorder %s638_s5, %s425_s24  ;;  %p429_p8 = scmp.lt.u32.totalorder %s425_s24, %s638_s5 }
 0x235   :  { %p431_p9 = pnand %p429_p8, %p426_p7 }
 0x237   :  { %434 = shalt.err (!%p431_p9)
}
 0x238   :  { %344 = dma.vmem_to_hbm [thread:$0]  %s342_s2, 128, %s638_s5, [#allocation10]  }
 0x239   :  { %s471_s5 = smov [#allocation8]  }
 0x23a   :  { %s331_s30 = sshll.u32 %s471_s5, 4  ;;  %s332_s30 = int_to_ptr.vmem [resolvable:$true] %s331_s30 }
 0x23b   :  { %s435_s6 = scalar_lea.vmem %s332_s30, 128  ;;  %p440_p11 = scmp.lt.s32.totalorder %s332_s30, %s332_s30 }
 0x23c   :  { %p436_p10 = scmp.ne.s32.totalorder %s332_s30, %s435_s6  ;;  %p441_p12 = scmp.lt.s32.totalorder %s435_s6, %s435_s6 }
 0x23e   :  { %p442_p13 = por %p441_p12, %p440_p11 }
 0x240   :  { %p443_p0 = pnand %p442_p13, %p436_p10 }
 0x28a   :  { %v194_v35 = vpop.permute.xlu1 %193  ;;  %v236_v39 = vpop.permute.xlu0 %235 }
 0x28b   :  { %v244_v36 = vmul.f32 %v194_v35, %v529_v2  ;;  %v250_v45 = vmul.f32 %v236_v39, %v553_v18 }
 0x28d   :  { %v252_v40 = vsel %vm74_vm0, %v244_v36, 0.0 }
 0x28e   :  { %v201_v37 = vpop.permute.xlu1 %200  ;;  %v253_v46 = vrot.slane %v252_v40, 4 }
 0x28f   :  { %v245_v38 = vmul.f32 %v201_v37, %v534_v4  ;;  %v294_v4 = vsel %vm74_vm0, %v250_v45, 0.0 }
 0x290   :  { %v254_v51 = vadd.f32 %v253_v46, %v252_v40 }
 0x291   :  { %v259_v41 = vsel %vm74_vm0, %v245_v38, 0.0 }
 0x292   :  { %v260_v42 = vrot.slane %v259_v41, 4  ;;  %v208_v43 = vpop.permute.xlu1 %207  ;;  %v255_v58 = vrot.slane %v254_v51, 2 }
 0x293   :  { %v246_v44 = vmul.f32 %v208_v43, %v538_v7  ;;  %v295_v7 = vrot.slane %v294_v4, 4 }
 0x294   :  { %v261_v48 = vadd.f32 %v260_v42, %v259_v41  ;;  %v256_v5 = vadd.f32 %v255_v58, %v254_v51 }
 0x295   :  { %v266_v47 = vsel %vm74_vm0, %v246_v44, 0.0  ;;  %v296_v0 = vadd.f32 %v295_v7, %v294_v4 }
 0x296   :  { %v267_v49 = vrot.slane %v266_v47, 4  ;;  %v215_v2 = vpop.permute.xlu1 %214  ;;  %v262_v54 = vrot.slane %v261_v48, 2  ;;  %v257_v21 = vrot.slane %v256_v5, 1 }
 0x297   :  { %v247_v50 = vmul.f32 %v215_v2, %v540_v8  ;;  %v297_v16 = vrot.slane %v296_v0, 2 }
 0x298   :  { %v268_v52 = vadd.f32 %v267_v49, %v266_v47  ;;  %v263_v61 = vadd.f32 %v262_v54, %v261_v48  ;;  %v258_v31 = vadd.f32 %v257_v21, %v256_v5 }
 0x299   :  { %v273_v53 = vsel %vm74_vm0, %v247_v50, 0.0  ;;  %v298_v29 = vadd.f32 %v297_v16, %v296_v0 }
 0x29a   :  { %v274_v55 = vrot.slane %v273_v53, 4  ;;  %v222_v56 = vpop.permute.xlu1 %221  ;;  %v269_v57 = vrot.slane %v268_v52, 2  ;;  %v264_v12 = vrot.slane %v263_v61, 1 }
 0x29b   :  { %v248_v18 = vmul.f32 %v222_v56, %v543_v10  ;;  %v299_v38 = vrot.slane %v298_v29, 1 }
 0x29c   :  { %v275_v59 = vadd.f32 %v274_v55, %v273_v53  ;;  %v270_v1 = vadd.f32 %v269_v57, %v268_v52 }
 0x29d   :  { %v280_v60 = vsel %vm74_vm0, %v248_v18, 0.0  ;;  %v300_v46 = vadd.f32 %v299_v38, %v298_v29 }
 0x29e   :  { %v276_v62 = vrot.slane %v275_v59, 2  ;;  %v281_v8 = vrot.slane %v280_v60, 4  ;;  %v229_v63 = vpop.permute.xlu1 %228  ;;  %v271_v17 = vrot.slane %v270_v1, 1 }
 0x29f   :  { %v249_v3 = vmul.f32 %v229_v63, %v547_v13  ;;  %v265_v13 = vadd.f32 %v264_v12, %v263_v61 }
 0x2a0   :  { %v277_v6 = vadd.f32 %v276_v62, %v275_v59  ;;  %v282_v9 = vadd.f32 %v281_v8, %v280_v60  ;;  %v272_v30 = vadd.f32 %v271_v17, %v270_v1 }
 0x2a1   :  { %v287_v11 = vsel %vm74_vm0, %v249_v3, 0.0  ;;  %v316_v36 = vsel %vm159_vm1, %v265_v13, %v258_v31 }
 0x2a2   :  { %v283_v14 = vrot.slane %v282_v9, 2  ;;  %v288_v10 = vrot.slane %v287_v11, 4  ;;  %v243_v15 = vpop.permute.xlu1 %242  ;;  %v278_v22 = vrot.slane %v277_v6, 1  ;;  %v317_v39 = vsel %vm161_vm2, %v272_v30, %v316_v36 }
 0x2a3   :  { %v251_v19 = vmul.f32 %v243_v15, %v556_v20 }
 0x2a4   :  { %v284_v23 = vadd.f32 %v283_v14, %v282_v9  ;;  %v289_v24 = vadd.f32 %v288_v10, %v287_v11  ;;  %v279_v32 = vadd.f32 %v278_v22, %v277_v6 }
 0x2a5   :  { %v301_v25 = vsel %vm74_vm0, %v251_v19, 0.0 }
 0x2a6   :  { %v285_v26 = vrot.slane %v284_v23, 1  ;;  %v290_v27 = vrot.slane %v289_v24, 2  ;;  %v302_v28 = vrot.slane %v301_v25, 4  ;;  %v318_v40 = vsel %vm163_vm3, %v279_v32, %v317_v39 }
 0x2a8   :  { %v291_v33 = vadd.f32 %v290_v27, %v289_v24  ;;  %v303_v34 = vadd.f32 %v302_v28, %v301_v25  ;;  %v286_v35 = vadd.f32 %v285_v26, %v284_v23 }
 0x2aa   :  { %v292_v20 = vrot.slane %v291_v33, 1  ;;  %v304_v37 = vrot.slane %v303_v34, 2  ;;  %v319_v43 = vsel %vm165_vm4, %v286_v35, %v318_v40 }
 0x2ac   :  { %v293_v41 = vadd.f32 %v292_v20, %v291_v33  ;;  %v305_v42 = vadd.f32 %v304_v37, %v303_v34 }
 0x2ae   :  { %v306_v44 = vrot.slane %v305_v42, 1  ;;  %v320_v45 = vsel %vm167_vm5, %v293_v41, %v319_v43 }
 0x2af   :  { %v321_v48 = vsel %vm169_vm6, %v300_v46, %v320_v45 }
 0x2b0   :  { %v307_v47 = vadd.f32 %v306_v44, %v305_v42 }
 0x2b2   :  { %v322_v49 = vsel %vm171_vm7, %v307_v47, %v321_v48 }
 0x2b3   :  { %324 = vst.msk [vmem:[#allocation8] sm:$0xff] %vm74_vm0, %v322_v49 }
 0x2b4   :  { %446 = shalt.err (!%p443_p0)
}
 0x2b5   :  { %s447_s9 = scalar_lea.hbm %s637_s4, 128 }
 0x2b6   :  { %p448_p1 = scmp.ne.s32.totalorder %s637_s4, %s447_s9  ;;  %p451_p2 = scmp.lt.u32.totalorder %s447_s9, %s637_s4 }
 0x2b8   :  { %p453_p3 = pnand %p451_p2, %p448_p1 }
 0x2ba   :  { %456 = shalt.err (!%p453_p3)
}
 0x2bb   :  { %334 = dma.vmem_to_hbm [thread:$0]  %s332_s30, 128, %s637_s4, [#allocation5]  }
 0x2bc   :  { %461 = dma.done.wait [#allocation5], 128  }
 0x2bd   :  { %462 = vsyncadd [#allocation5], 4294967168 }
 0x2be   :  { %463 = dma.done.wait [#allocation10], 128  }
 0x2bf   :  { %464 = vsyncadd [#allocation10], 4294967168 }
 0x2c0   :  { %351 = vsyncpa [#allocation4], 1 }
 0x2c1   :  { %352 = vsyncpa [#allocation7], 1 }
 0x2c2   :  { %353 = vsyncpa [#allocation5], 1 }
 0x2c3   :  { %354 = vsyncpa [#allocation10], 1 }

</bundles_post_ra>
